<compile_context>
chip_gen: v7x
topology: tpu7x:2x2x1
jax: 0.10.0
libtpu: 0.0.40
codegen_flags: <defaults>
</compile_context>

<pallas_src>
import jax
import jax.numpy as jnp
from jax.experimental import pallas as pl
from jax.experimental.pallas import tpu as pltpu


# Leading ("parallel") grid axis: independent sequential chunks of the token
# stream.  On a 2-TensorCore chip (v7x) each chunk gets its own core; on 1-TC
# chips (v5e/v6e) the chunks simply run back-to-back -- correct either way.
_NUM_CORE_CHUNKS = 2

# VMEM budget (bytes) for the HBM-gather path's buffers:
#   2 x (tm, ninp) pipelined output block + (2, tm, ninp) landing buffer.
_GATHER_VMEM_BUDGET = 8 * 1024 * 1024

# Cap on the statically unrolled per-tile DMA issue/wait loops.
_MAX_TM = 64


def _sublane_multiple(dtype):
    # f32 -> 8, bf16 -> 16, int8/fp8 -> 32 (packed-sublane tiling rule).
    return max(8, 32 // jnp.dtype(dtype).itemsize)


def _pick_tm(ninp, dtype):
    mult = _sublane_multiple(dtype)
    itemsize = jnp.dtype(dtype).itemsize
    tm = _GATHER_VMEM_BUDGET // max(1, 4 * ninp * itemsize)
    tm = (tm // mult) * mult
    return int(max(mult, min(_MAX_TM, tm)))


# ---------------------------------------------------------------------------
# Large-table path: HBM-resident table, double-buffered row-DMA gather with
# cross-step prefetch.
# ---------------------------------------------------------------------------
def _embedding_gather_hbm_kernel(ids_ref, tbl_hbm, o_ref, buf, sems):
    # ids_ref: SMEM (m_pad,) int32  - scalar-prefetched token ids (whole grid)
    # tbl_hbm: HBM  (vocab, ninp)   - never copied wholesale into VMEM
    # o_ref:   VMEM (tm, ninp)      - this step's output block (auto-pipelined)
    # buf:     VMEM (2, tm, ninp)   - double-buffered gather landing area
    # sems:    DMA semaphores (2,)  - one per landing slot
    tm = o_ref.shape[0]
    chunk = pl.program_id(0)          # "parallel" axis (per-core chunk)
    j = pl.program_id(1)              # sequential position within the chunk
    n_inner = pl.num_programs(1)
    gstep = chunk * n_inner + j       # global tile index -> offset into ids

    def issue(global_step, slot):
        base = global_step * tm
        for t in range(tm):           # bounded static unroll (tm <= _MAX_TM)
            row = ids_ref[base + t]   # dynamic scalar read from SMEM
            pltpu.make_async_copy(
                tbl_hbm.at[pl.ds(row, 1), :],      # one (1, ninp) row in HBM
                buf.at[slot, pl.ds(t, 1), :],      # its slot in the landing tile
                sems.at[slot],                     # all tm copies share one sem
            ).start()

    # Prologue: the first step of each chunk gathers its own tile.
    @pl.when(j == 0)
    def _():
        issue(gstep, 0)

    # Cross-step prefetch: issue the *next* tile's row DMAs before waiting on
    # this tile's, so the next HBM round-trip overlaps this step's wait+store.
    @pl.when(j + 1 < n_inner)
    def _():
        issue(gstep + 1, (j + 1) & 1)

    # Drain this tile: tm cheap waits on the single per-slot semaphore.  (Only
    # sem + transfer size matter for a wait, so a dummy src index is fine.)
    slot = j & 1
    for t in range(tm):
        pltpu.make_async_copy(
            tbl_hbm.at[pl.ds(0, 1), :],
            buf.at[slot, pl.ds(t, 1), :],
            sems.at[slot],
        ).wait()

    # Lane-dense vector store into the pipelined output block.  All waits are
    # above, so the automatic writeback only ever sees completed data.
    o_ref[...] = buf[slot]


def _embedding_lookup_hbm(ids_flat, table, tm):
    vocab, ninp = table.shape
    itemsize = jnp.dtype(table.dtype).itemsize
    M = ids_flat.shape[0]

    tile_tokens = tm * _NUM_CORE_CHUNKS
    m_pad = pl.cdiv(M, tile_tokens) * tile_tokens
    if m_pad != M:
        # Padded slots gather row 0 (the padding_idx row) and are sliced off.
        ids_flat = jnp.pad(ids_flat, (0, m_pad - M))
    steps_per_chunk = m_pad // tile_tokens

    out = pl.pallas_call(
        _embedding_gather_hbm_kernel,
        out_shape=jax.ShapeDtypeStruct((m_pad, ninp), table.dtype),
        grid_spec=pltpu.PrefetchScalarGridSpec(
            num_scalar_prefetch=1,                          # ids -> SMEM
            grid=(_NUM_CORE_CHUNKS, steps_per_chunk),
            in_specs=[pl.BlockSpec(memory_space=pl.ANY)],   # table stays in HBM
            out_specs=pl.BlockSpec(
                (tm, ninp), lambda i, j, ids: (i * steps_per_chunk + j, 0)),
            scratch_shapes=[
                pltpu.VMEM((2, tm, ninp), table.dtype),
                pltpu.SemaphoreType.DMA((2,)),
            ],
        ),
        compiler_params=pltpu.CompilerParams(
            dimension_semantics=("parallel", "arbitrary")),
        cost_estimate=pl.CostEstimate(
            flops=0, transcendentals=0,
            bytes_accessed=2 * m_pad * ninp * itemsize + 4 * m_pad),
    )(ids_flat, table)
    return out[:M]


# ---------------------------------------------------------------------------
# Small-table fast path: table resident in VMEM, gather as a one-hot MXU matmul.
# ---------------------------------------------------------------------------
def _embedding_onehot_kernel(ids_ref, tbl_ref, o_ref):
    # ids_ref: VMEM (tm, 1) int32; tbl_ref: VMEM (vocab, ninp); o_ref: (tm, ninp)
    tm = o_ref.shape[0]
    vocab = tbl_ref.shape[0]
    ids = ids_ref[...]                                              # (tm, 1)
    cols = jax.lax.broadcasted_iota(jnp.int32, (tm, vocab), 1)
    one_hot = (ids == cols).astype(tbl_ref.dtype)
    # One operand is exactly 0/1, so HIGHEST precision keeps the gather
    # numerically exact even for f32 tables.
    o_ref[...] = jnp.dot(
        one_hot, tbl_ref[...],
        precision=jax.lax.Precision.HIGHEST,
        preferred_element_type=jnp.float32,
    ).astype(o_ref.dtype)


def _embedding_lookup_vmem(ids_flat, table, tm):
    vocab, ninp = table.shape
    M = ids_flat.shape[0]
    m_pad = pl.cdiv(M, tm) * tm
    if m_pad != M:
        ids_flat = jnp.pad(ids_flat, (0, m_pad - M))
    ids_col = ids_flat.reshape(m_pad, 1)

    out = pl.pallas_call(
        _embedding_onehot_kernel,
        out_shape=jax.ShapeDtypeStruct((m_pad, ninp), table.dtype),
        grid=(m_pad // tm,),
        in_specs=[
            pl.BlockSpec((tm, 1), lambda i: (i, 0)),
            pl.BlockSpec((vocab, ninp), lambda i: (0, 0)),   # table stays in VMEM
        ],
        out_specs=pl.BlockSpec((tm, ninp), lambda i: (i, 0)),
        compiler_params=pltpu.CompilerParams(
            dimension_semantics=("parallel",)),
    )(ids_col, table)
    return out[:M]


# ---------------------------------------------------------------------------
# Public wrapper (dispatch) + init matching nn.Embedding(padding_idx=0).
# ---------------------------------------------------------------------------
def embedding_lookup(ids, table, *, tm=None, path="auto",
                     vmem_table_bytes=2 * 1024 * 1024):
    """Forward of nn.Embedding(vocab, ninp, padding_idx=0): out = table[ids].

    `ids` may have any shape; returns ids.shape + (ninp,).  padding_idx
    semantics are carried by the table itself (row 0 is zeroed at init).
    """
    vocab, ninp = table.shape
    orig_shape = ids.shape
    ids_flat = ids.reshape(-1).astype(jnp.int32)

    mult = _sublane_multiple(table.dtype)
    if tm is None:
        tm = _pick_tm(ninp, table.dtype)
    else:
        tm = max(mult, ((int(tm) + mult - 1) // mult) * mult)

    table_bytes = vocab * ninp * jnp.dtype(table.dtype).itemsize
    if path == "auto":
        path = "vmem" if table_bytes <= vmem_table_bytes else "hbm"

    if path == "vmem":
        out = _embedding_lookup_vmem(ids_flat, table, tm)
    elif path == "hbm":
        out = _embedding_lookup_hbm(ids_flat, table, tm)
    else:
        raise ValueError(f"unknown path: {path!r}")

    return out.reshape(*orig_shape, ninp)


def init_embedding(key, vocab_size, ninp):
    """Matches nn.Embedding default init (N(0,1)) with the padding_idx=0 row zeroed."""
    w = jax.random.normal(key, (vocab_size, ninp), jnp.float32)
    return w.at[0].set(0.0)


if __name__ == "__main__":
    vocab_size, ninp = 64, 128             # ninp a multiple of 128 (lane-dense)
    key = jax.random.PRNGKey(0)
    k_ids, k_ids2, k_w = jax.random.split(key, 3)
    table = init_embedding(k_w, vocab_size, ninp)

    # --- small-table fast path (table in VMEM, one-hot MXU gather) ---
    ids = jax.random.randint(k_ids, (2, 8), 0, vocab_size, dtype=jnp.int32)
    ids = ids.at[0, 0].set(0)              # exercise the padding_idx row
    out = jax.block_until_ready(embedding_lookup(ids, table))
    ref = jnp.take(table, ids, axis=0)
    assert out.shape == (2, 8, ninp)
    assert jnp.allclose(out, ref, rtol=0.0, atol=1e-5)
    assert jnp.all(out[0, 0] == 0.0)       # padding_idx row is zero

    # --- large-table path (HBM table, double-buffered row-DMA gather), forced
    #     here on a small table so both kernels run; tm=8 with 4x16 tokens gives
    #     several sequential steps per chunk so the cross-step prefetch and
    #     slot alternation are actually exercised. ---
    ids2 = jax.random.randint(k_ids2, (4, 16), 0, vocab_size, dtype=jnp.int32)
    ids2 = ids2.at[1, 3].set(0)
    out2 = jax.block_until_ready(embedding_lookup(ids2, table, path="hbm", tm=8))
    ref2 = jnp.take(table, ids2, axis=0)
    assert out2.shape == (4, 16, ninp)
    assert jnp.array_equal(out2, ref2)     # pure byte-copy gather -> exact
    assert jnp.all(out2[1, 3] == 0.0)

    print("KERNEL_OK")
</pallas_src>

<mosaic_0001>
module attributes {stable_mosaic.version = 11 : i64} {
  func.func @_embedding_onehot_kernel(%arg0: i32, %arg1: memref<64x1xi32, #tpu.memory_space<vmem>>, %arg2: memref<64x128xf32, #tpu.memory_space<vmem>>, %arg3: memref<64x128xf32, #tpu.memory_space<vmem>>) attributes {dimension_semantics = [#tpu.dimension_semantics<parallel>], iteration_bounds = array<i64: 1>, scalar_prefetch = 0 : i64, scratch_operands = 0 : i64, tpu.core_type = #tpu.core_type<tc>, window_params = [{transform_indices = @transform_0, window_bounds = array<i64: 64, 1>}, {pipeline_mode = #tpu.pipeline_mode<synchronous>, transform_indices = @transform_1, window_bounds = array<i64: 64, 128>}, {transform_indices = @transform_2, window_bounds = array<i64: 64, 128>}]} {
    %c0 = arith.constant 0 : index
    %c0_0 = arith.constant 0 : index
    %0 = vector.load %arg1[%c0, %c0_0] : memref<64x1xi32, #tpu.memory_space<vmem>>, vector<64x1xi32>
    %1 = tpu.iota {dimensions = array<i32: 1>} : vector<64x64xi32>
    %2 = vector.broadcast %0 : vector<64x1xi32> to vector<64x64xi32>
    %3 = arith.cmpi eq, %2, %1 : vector<64x64xi32>
    %4 = arith.extui %3 : vector<64x64xi1> to vector<64x64xi32>
    %5 = arith.sitofp %4 : vector<64x64xi32> to vector<64x64xf32>
    %c0_1 = arith.constant 0 : index
    %c0_2 = arith.constant 0 : index
    %6 = vector.load %arg2[%c0_1, %c0_2] : memref<64x128xf32, #tpu.memory_space<vmem>>, vector<64x128xf32>
    %cst = arith.constant dense<0.000000e+00> : vector<64x128xf32>
    %7 = tpu.matmul %5, %6, %cst {dimension_numbers = #tpu.dot_dimension_numbers<[1], [0], [0], [1], [0, 0, 1, 1], [], []>, precision = #tpu.contract_precision<fp32>} : vector<64x64xf32>, vector<64x128xf32>, vector<64x128xf32> -> vector<64x128xf32>
    %c0_3 = arith.constant 0 : index
    %c0_4 = arith.constant 0 : index
    %8 = vector.load %arg3[%c0_3, %c0_4] : memref<64x128xf32, #tpu.memory_space<vmem>>, vector<64x128xf32>
    tpu.vector_store %arg3[%c0_3, %c0_4], %7 {strides = array<i32>} : memref<64x128xf32, #tpu.memory_space<vmem>>, vector<64x128xf32>,
    return
  }
  func.func @transform_0(%arg0: i32) -> (i32, i32) {
    %c0_i32 = arith.constant 0 : i32
    %c0_i32_0 = arith.constant 0 : i32
    return %arg0, %c0_i32 : i32, i32
  }
  func.func @transform_1(%arg0: i32) -> (i32, i32) {
    %c0_i32 = arith.constant 0 : i32
    %c0_i32_0 = arith.constant 0 : i32
    %c0_i32_1 = arith.constant 0 : i32
    return %c0_i32, %c0_i32_0 : i32, i32
  }
  func.func @transform_2(%arg0: i32) -> (i32, i32) {
    %c0_i32 = arith.constant 0 : i32
    %c0_i32_0 = arith.constant 0 : i32
    return %arg0, %c0_i32 : i32, i32
  }
}

</mosaic_0001>

<bundles_post_ra>
// kernel: tpu_custom_call.1
= control target key start
LH: loop header
LB: loop body
LE: loop exit
PB: predicated region body
PF: predicated region fallthrough
CT: control target
= control target key end

     0   :  { %v1428_v2 = vmov 0   ;;  %s1718_s0 = inlined_call_operand.vmem [shape: s32[64,1], index: 0, kind: input, shape index: {}]   ;;  %s1719_s1 = inlined_call_operand.vmem [shape: f32[64,128], index: 1, kind: input, shape index: {}]   ;;  %s1720_s2 = inlined_call_operand.hbm [shape: f32[64,128], index: 2, kind: output, shape index: {}]  }
   0x1   :  { %v14_v0 = vld [vmem:[%s1718_s0 + $0x10] sm:$0xff]  ;;  %v12_v1 = vld [vmem:[%s1718_s0] sm:$0xff]  ;;  %1403 = vset.pattern.permute.xlu1 %v1428_v2  ;;  %1402 = vset.pattern.permute.xlu0 %v1428_v2  ;;  %v15_v3 = vld [vmem:[%s1718_s0 + $0x18] sm:$0xff] }
   0x2   :  { %29 = vperm.xlu1 %1403, %v14_v0   ;;  %23 = vperm.xlu0 %1402, %v12_v1   ;;  %v13_v4 = vld [vmem:[%s1718_s0 + $0x8] sm:$0xff]  ;;  %v70_v5 = vld [vmem:[%s1719_s1] sm:$0xff]  ;;  %v72_v8 = vld [vmem:[%s1719_s1 + $0x10] sm:$0xff] }
   0x3   :  { %v71_v6 = vld [vmem:[%s1719_s1 + $0x8] sm:$0xff]  ;;  %v104_v7 = vand.u32 4294901760, %v70_v5  ;;  %v73_v9 = vld [vmem:[%s1719_s1 + $0x18] sm:$0xff]  ;;  %v110_v11 = vand.u32 4294901760, %v72_v8  ;;  %v74_v13 = vld [vmem:[%s1719_s1 + $0x20] sm:$0xff] }
   0x4   :  { %v107_v10 = vand.u32 4294901760, %v71_v6  ;;  %v113_v12 = vand.u32 4294901760, %v73_v9  ;;  %v75_v14 = vld [vmem:[%s1719_s1 + $0x28] sm:$0xff] }
   0x5   :  { %7 = vsyncpa [#allocation3], 0  ;;  %v116_v16 = vand.u32 4294901760, %v74_v13  ;;  %v76_v17 = vld [vmem:[%s1719_s1 + $0x30] sm:$0xff]  ;;  %v77_v18 = vld [vmem:[%s1719_s1 + $0x38] sm:$0xff]  ;;  %v119_v22 = vand.u32 4294901760, %v75_v14  ;;  %v1494_v23 = vsub.f32 %v70_v5, %v104_v7  ;;  %v272_v34 = vsub.f32 %v72_v8, %v110_v11 }
   0x6   :  { %32 = vperm.xlu1 %1403, %v15_v3   ;;  %26 = vperm.xlu0 %1402, %v13_v4   ;;  %v1478_v15 = vpack.c.bf16 %v107_v10, %v104_v7  ;;  %v17_v19 = vld [vmem:[%s1718_s0 + $0x28] sm:$0xff]  ;;  %v16_v20 = vld [vmem:[%s1718_s0 + $0x20] sm:$0xff]  ;;  %v1492_v21 = vpack.c.bf16 %v113_v12, %v110_v11  ;;  %v1496_v24 = vsub.f32 %v71_v6, %v107_v10  ;;  %v122_v25 = vand.u32 4294901760, %v76_v17  ;;  %v19_v29 = vld [vmem:[%s1718_s0 + $0x38] sm:$0xff] }
   0x7   :  { %v125_v26 = vand.u32 4294901760, %v77_v18  ;;  %v259_v27 = vand.u32 4294901760, %v1494_v23  ;;  %v18_v30 = vld [vmem:[%s1718_s0 + $0x30] sm:$0xff]  ;;  %v1512_v31 = vpack.c.bf16 %v119_v22, %v116_v16  ;;  %v279_v35 = vsub.f32 %v73_v9, %v113_v12  ;;  %s1430_s0 = smov [#allocation2]  }
   0x8   :  { %1310 = vmatprep.subr.bf16.mxu0 %v1478_v15  ;;  %1262 = vmatprep.subr.bf16.mxu1 %v1478_v15  ;;  %v266_v28 = vand.u32 4294901760, %v1496_v24  ;;  %v273_v39 = vand.u32 4294901760, %v272_v34  ;;  %v286_v44 = vsub.f32 %v74_v13, %v116_v16  ;;  %v293_v46 = vsub.f32 %v75_v14, %v119_v22  ;;  %s954_s12 = sshll.u32 %s1430_s0, 4  ;;  %s955_s12 = int_to_ptr.vmem [resolvable:$true] %s954_s12 }
   0x9   :  { %1312 = vmatpush3.bf16.msra.mxu0 %v1478_v15  ;;  %1264 = vmatpush3.bf16.msra.mxu1 %v1478_v15  ;;  %v260_v32 = vsub.f32 %v1494_v23, %v259_v27  ;;  %v1518_v36 = vpack.c.bf16 %v125_v26, %v122_v25  ;;  %v280_v40 = vand.u32 4294901760, %v279_v35  ;;  %v300_v54 = vsub.f32 %v76_v17, %v122_v25  ;;  %s1404_s13 = scalar_lea.vmem %s955_s12, 1024  ;;  %p1409_p1 = scmp.lt.s32.totalorder %s955_s12, %s955_s12 }
   0xa   :  { %38 = vperm.xlu1 %1403, %v17_v19   ;;  %35 = vperm.xlu0 %1402, %v16_v20   ;;  %v267_v33 = vsub.f32 %v1496_v24, %v266_v28  ;;  %v274_v42 = vsub.f32 %v272_v34, %v273_v39  ;;  %v1526_v45 = vpack.c.bf16 %v266_v28, %v259_v27  ;;  %v287_v50 = vand.u32 4294901760, %v286_v44  ;;  %p1405_p0 = scmp.ne.s32.totalorder %s955_s12, %s1404_s13  ;;  %p1410_p2 = scmp.lt.s32.totalorder %s1404_s13, %s1404_s13 }
   0xb   :  { %1314 = vmatprep.subr.bf16.mxu0 %v1492_v21  ;;  %1266 = vmatprep.subr.bf16.mxu1 %v1492_v21  ;;  %v261_v37 = vand.u32 4294901760, %v260_v32  ;;  %v1522_v41 = vpack.c.bf16 %v280_v40, %v273_v39  ;;  %v281_v43 = vsub.f32 %v279_v35, %v280_v40  ;;  %v294_v51 = vand.u32 4294901760, %v293_v46 }
   0xc   :  { %v268_v38 = vand.u32 4294901760, %v267_v33  ;;  %v275_v48 = vand.u32 4294901760, %v274_v42  ;;  %v288_v53 = vsub.f32 %v286_v44, %v287_v50  ;;  %v307_v55 = vsub.f32 %v77_v18, %v125_v26  ;;  %p1411_p3 = por %p1410_p2, %p1409_p1 }
   0xd   :  { %1316 = vmatpush3.bf16.msra.mxu0 %v1492_v21  ;;  %1268 = vmatpush3.bf16.msra.mxu1 %v1492_v21  ;;  %v282_v49 = vand.u32 4294901760, %v281_v43  ;;  %v1536_v56 = vpack.c.bf16 %v294_v51, %v287_v50  ;;  %v295_v57 = vsub.f32 %v293_v46, %v294_v51  ;;  %v301_v59 = vand.u32 4294901760, %v300_v54 }
   0xe   :  { %44 = vperm.xlu1 %1403, %v19_v29   ;;  %41 = vperm.xlu0 %1402, %v18_v30   ;;  %v1530_v47 = vpack.c.bf16 %v268_v38, %v261_v37  ;;  %v289_v58 = vand.u32 4294901760, %v288_v53  ;;  %v308_v60 = vand.u32 4294901760, %v307_v55  ;;  %v1548_v5 = vpack.c.bf16 %v1496_v24, %v1494_v23  ;;  %p1412_p4 = pnand %p1411_p3, %p1405_p0 }
   0xf   :  { %1318 = vmatprep.subr.bf16.mxu0 %v1512_v31  ;;  %1270 = vmatprep.subr.bf16.mxu1 %v1512_v31  ;;  %v1532_v52 = vpack.c.bf16 %v282_v49, %v275_v48  ;;  %v296_v61 = vand.u32 4294901760, %v295_v57  ;;  %v302_v63 = vsub.f32 %v300_v54, %v301_v59  ;;  %v1550_v6 = vpack.c.bf16 %v279_v35, %v272_v34 }
  0x10   :  { %v1540_v62 = vpack.c.bf16 %v308_v60, %v301_v59  ;;  %v309_v0 = vsub.f32 %v307_v55, %v308_v60  ;;  %v1552_v7 = vpack.c.bf16 %v293_v46, %v286_v44  ;;  %v1554_v8 = vpack.c.bf16 %v307_v55, %v300_v54 }
  0x11   :  { %1320 = vmatpush3.bf16.msra.mxu0 %v1512_v31  ;;  %1272 = vmatpush3.bf16.msra.mxu1 %v1512_v31  ;;  %v1542_v1 = vpack.c.bf16 %v296_v61, %v289_v58  ;;  %v303_v2 = vand.u32 4294901760, %v302_v63  ;;  %v20_v9 = vlaneseq  ;;  %vm78_vm0 = vcmask 523264  }
  0x12   :  { %1322 = vmatprep.subr.bf16.mxu0 %v1518_v36  ;;  %1274 = vmatprep.subr.bf16.mxu1 %v1518_v36  ;;  %v310_v3 = vand.u32 4294901760, %v309_v0  ;;  %v1429_v13 = vmov 0.0  }
  0x13   :  { %v21_v10 = vand.u32 127, %v20_v9 }
  0x14   :  { %v1544_v4 = vpack.c.bf16 %v310_v3, %v303_v2 }
  0x15   :  { %1324 = vmatpush3.bf16.msra.mxu0 %v1518_v36  ;;  %1276 = vmatpush3.bf16.msra.mxu1 %v1518_v36 }
  0x16   :  { %1326 = vmatprep.subr.bf16.mxu0 %v1526_v45  ;;  %1278 = vmatprep.subr.bf16.mxu1 %v1530_v47 }
  0x81   :  { %v30_v11 = vpop.permute.xlu1 %29  ;;  %v24_v12 = vpop.permute.xlu0 %23 }
  0x82   :  { %vm48_vm1 = vcmp.eq.s32.totalorder %v30_v11, %v21_v10  ;;  %vm46_vm2 = vcmp.eq.s32.totalorder %v24_v12, %v21_v10 }
  0x83   :  { %v1556_v14 = vsel %vm48_vm1, 1.0, %v1429_v13  ;;  %v1558_v16 = vsel %vm46_vm2, 1.0, %v1429_v13 }
  0x84   :  { %v86_v17 = vsel %vm78_vm0, %v1556_v14, 0  ;;  %v80_v18 = vsel %vm78_vm0, %v1558_v16, 0 }
  0x85   :  { %v1564_v19 = vsub.f32 %v86_v17, %v86_v17  ;;  %v1566_v20 = vsub.f32 %v80_v18, %v80_v18  ;;  %v33_v22 = vpop.permute.xlu1 %32  ;;  %v27_v23 = vpop.permute.xlu0 %26 }
  0x86   :  { %vm49_vm3 = vcmp.eq.s32.totalorder %v33_v22, %v21_v10  ;;  %vm47_vm4 = vcmp.eq.s32.totalorder %v27_v23, %v21_v10 }
  0x87   :  { %v1568_v24 = vsel %vm49_vm3, 1.0, %v1429_v13  ;;  %v1570_v25 = vsel %vm47_vm4, 1.0, %v1429_v13  ;;  %v178_v26 = vand.u32 4294901760, %v1566_v20  ;;  %v198_v29 = vand.u32 4294901760, %v1564_v19 }
  0x88   :  { %v89_v27 = vsel %vm78_vm0, %v1568_v24, 0  ;;  %v83_v28 = vsel %vm78_vm0, %v1570_v25, 0 }
  0x89   :  { %v1578_v30 = vsub.f32 %v89_v27, %v89_v27  ;;  %v1580_v32 = vsub.f32 %v83_v28, %v83_v28  ;;  %v39_v33 = vpop.permute.xlu1 %38  ;;  %1193 = vmatprep.mubr.f32.mxu0 %v178_v26  ;;  %v36_v34 = vpop.permute.xlu0 %35  ;;  %v179_v35 = vsub.f32 %v1566_v20, %v178_v26  ;;  %v199_v46 = vsub.f32 %v1564_v19, %v198_v29 }
  0x8a   :  { %vm51_vm5 = vcmp.eq.s32.totalorder %v39_v33, %v21_v10  ;;  %vm50_vm6 = vcmp.eq.s32.totalorder %v36_v34, %v21_v10 }
  0x8b   :  { %v1583_v37 = vsel %vm51_vm5, 1.0, %v1429_v13  ;;  %v1585_v38 = vsel %vm50_vm6, 1.0, %v1429_v13  ;;  %v180_v39 = vand.u32 4294901760, %v179_v35  ;;  %v188_v40 = vand.u32 4294901760, %v1580_v32 }
  0x8c   :  { %v95_v42 = vsel %vm78_vm0, %v1583_v37, 0  ;;  %v92_v43 = vsel %vm78_vm0, %v1585_v38, 0  ;;  %v208_v44 = vand.u32 4294901760, %v1578_v30  ;;  %v200_v63 = vand.u32 4294901760, %v199_v46 }
  0x8d   :  { %v1594_v48 = vsub.f32 %v95_v42, %v95_v42  ;;  %v1596_v49 = vsub.f32 %v92_v43, %v92_v43  ;;  %v45_v50 = vpop.permute.xlu1 %44  ;;  %1109 = vmatprep.mubr.f32.mxu1 %v180_v39  ;;  %1194 = vmatmul.mubr.f32.vlgmr.msra.gmra.mrb[0].mxu0 %v188_v40  ;;  %v42_v51 = vpop.permute.xlu0 %41  ;;  %v189_v53 = vsub.f32 %v1580_v32, %v188_v40 }
  0x8e   :  { %vm53_vm7 = vcmp.eq.s32.totalorder %v45_v50, %v21_v10  ;;  %vm52_vm8 = vcmp.eq.s32.totalorder %v42_v51, %v21_v10  ;;  %1196 = vmatprep.mubr.f32.mxu0 %v198_v29  ;;  %1328 = vmatpush3.bf16.msra.mxu0 %v1526_v45  ;;  %v209_v54 = vsub.f32 %v1578_v30, %v208_v44 }
  0x8f   :  { %v1601_v55 = vsel %vm53_vm7, 1.0, %v1429_v13  ;;  %v1603_v57 = vsel %vm52_vm8, 1.0, %v1429_v13  ;;  %v190_v58 = vand.u32 4294901760, %v189_v53  ;;  %1330 = vmatprep.subr.bf16.mxu0 %v1522_v41  ;;  %v218_v59 = vand.u32 4294901760, %v1596_v49 }
  0x90   :  { %v101_v60 = vsel %vm78_vm0, %v1601_v55, 0  ;;  %v98_v61 = vsel %vm78_vm0, %v1603_v57, 0  ;;  %v228_v45 = vand.u32 4294901760, %v1594_v48  ;;  %v210_v9 = vand.u32 4294901760, %v209_v54 }
  0x91   :  { %v1612_v0 = vsub.f32 %v101_v60, %v101_v60  ;;  %v1614_v2 = vsub.f32 %v98_v61, %v98_v61  ;;  %1110 = vmatmul.mubr.f32.vlgmr.msra.gmra.mrb[0].mxu1 %v190_v58  ;;  %1197 = vmatmul.mubr.f32.gmra.mrb[2].mxu0 %v208_v44  ;;  %v219_v3 = vsub.f32 %v1596_v49, %v218_v59 }
  0x92   :  { %1280 = vmatpush3.bf16.msra.mxu1 %v1530_v47  ;;  %1112 = vmatprep.mubr.f32.mxu1 %v200_v63  ;;  %v229_v12 = vsub.f32 %v1594_v48, %v228_v45 }
  0x93   :  { %1199 = vmatprep.mubr.f32.mxu0 %v218_v59  ;;  %1332 = vmatpush3.bf16.msra.mxu0 %v1522_v41  ;;  %v220_v10 = vand.u32 4294901760, %v219_v3  ;;  %v238_v11 = vand.u32 4294901760, %v1614_v2  ;;  %v248_v13 = vand.u32 4294901760, %v1612_v0 }
  0x94   :  { %1282 = vmatprep.subr.bf16.mxu1 %v1532_v52  ;;  %1334 = vmatprep.subr.bf16.mxu0 %v1536_v56  ;;  %v230_v41 = vand.u32 4294901760, %v229_v12 }
  0x95   :  { %1113 = vmatmul.mubr.f32.gmra.mrb[2].mxu1 %v210_v9  ;;  %1200 = vmatmul.mubr.f32.gmra.mrb[4].mxu0 %v228_v45  ;;  %v239_v47 = vsub.f32 %v1614_v2, %v238_v11  ;;  %v249_v18 = vsub.f32 %v1612_v0, %v248_v13 }
  0x96   :  { %1284 = vmatpush3.bf16.msra.mxu1 %v1532_v52  ;;  %1115 = vmatprep.mubr.f32.mxu1 %v220_v10 }
  0x97   :  { %1202 = vmatprep.mubr.f32.mxu0 %v238_v11  ;;  %1336 = vmatpush3.bf16.msra.mxu0 %v1536_v56  ;;  %v240_v17 = vand.u32 4294901760, %v239_v47  ;;  %v250_v52 = vand.u32 4294901760, %v249_v18 }
  0x98   :  { %1286 = vmatprep.subr.bf16.mxu1 %v1542_v1  ;;  %1338 = vmatprep.subr.bf16.mxu0 %v1540_v62 }
  0x99   :  { %1116 = vmatmul.mubr.f32.gmra.mrb[4].mxu1 %v230_v41  ;;  %1203 = vmatmul.mubr.f32.gmra.mrb[6].mxu0 %v248_v13 }
  0x9a   :  { %1288 = vmatpush3.bf16.msra.mxu1 %v1542_v1  ;;  %1118 = vmatprep.mubr.f32.mxu1 %v240_v17 }
  0x9b   :  { %1340 = vmatpush3.bf16.msra.mxu0 %v1540_v62  ;;  %1221 = vmatprep.mubr.msk.f32.mxu0 %vm78_vm0, %v1558_v16 }
  0x9c   :  { %1290 = vmatprep.subr.bf16.mxu1 %v1544_v4  ;;  %1342 = vmatprep.subr.bf16.mxu0 %v1478_v15 }
  0x9d   :  { %1119 = vmatmul.mubr.f32.gmra.mrb[6].mxu1 %v250_v52 }
  0x9e   :  { %1292 = vmatpush3.bf16.msra.mxu1 %v1544_v4  ;;  %1222 = vmatmul.mubr.msk.f32.vlgmr.msra.gmra.mrb[0].mxu0 %vm78_vm0, %v1570_v25 }
  0x9f   :  { %1137 = vmatprep.mubr.msk.f32.mxu1 %vm78_vm0, %v1558_v16  ;;  %1224 = vmatprep.mubr.msk.f32.mxu0 %vm78_vm0, %v1556_v14 }
  0xa0   :  { %1344 = vmatpush3.bf16.msra.mxu0 %v1478_v15  ;;  %1294 = vmatprep.subr.bf16.mxu1 %v1548_v5 }
  0xa1   :  { %1138 = vmatmul.mubr.msk.f32.vlgmr.msra.gmra.mrb[0].mxu1 %vm78_vm0, %v1570_v25  ;;  %1346 = vmatprep.subr.bf16.mxu0 %v1492_v21 }
  0xa2   :  { %1296 = vmatpush3.bf16.msra.mxu1 %v1548_v5  ;;  %1225 = vmatmul.mubr.msk.f32.gmra.mrb[2].mxu0 %vm78_vm0, %v1568_v24 }
  0xa3   :  { %1140 = vmatprep.mubr.msk.f32.mxu1 %vm78_vm0, %v1556_v14  ;;  %1227 = vmatprep.mubr.msk.f32.mxu0 %vm78_vm0, %v1585_v38 }
  0xa4   :  { %1348 = vmatpush3.bf16.msra.mxu0 %v1492_v21  ;;  %1298 = vmatprep.subr.bf16.mxu1 %v1550_v6 }
  0xa5   :  { %1141 = vmatmul.mubr.msk.f32.gmra.mrb[2].mxu1 %vm78_vm0, %v1568_v24  ;;  %1350 = vmatprep.subr.bf16.mxu0 %v1512_v31 }
  0xa6   :  { %1300 = vmatpush3.bf16.msra.mxu1 %v1550_v6  ;;  %1228 = vmatmul.mubr.msk.f32.gmra.mrb[4].mxu0 %vm78_vm0, %v1583_v37 }
  0xa7   :  { %1143 = vmatprep.mubr.msk.f32.mxu1 %vm78_vm0, %v1585_v38  ;;  %1230 = vmatprep.mubr.msk.f32.mxu0 %vm78_vm0, %v1603_v57 }
  0xa8   :  { %1352 = vmatpush3.bf16.msra.mxu0 %v1512_v31  ;;  %1302 = vmatprep.subr.bf16.mxu1 %v1552_v7 }
  0xa9   :  { %1144 = vmatmul.mubr.msk.f32.gmra.mrb[4].mxu1 %vm78_vm0, %v1583_v37  ;;  %1354 = vmatprep.subr.bf16.mxu0 %v1518_v36 }
  0xaa   :  { %1304 = vmatpush3.bf16.msra.mxu1 %v1552_v7  ;;  %1231 = vmatmul.mubr.msk.f32.gmra.mrb[6].mxu0 %vm78_vm0, %v1601_v55 }
  0xab   :  { %1146 = vmatprep.mubr.msk.f32.mxu1 %vm78_vm0, %v1603_v57  ;;  %1249 = vmatprep.mubr.msk.f32.mxu0 %vm78_vm0, %v1558_v16 }
  0xac   :  { %1356 = vmatpush3.bf16.msra.mxu0 %v1518_v36  ;;  %1306 = vmatprep.subr.bf16.mxu1 %v1554_v8 }
  0xad   :  { %1147 = vmatmul.mubr.msk.f32.gmra.mrb[6].mxu1 %vm78_vm0, %v1601_v55 }
  0xae   :  { %1308 = vmatpush3.bf16.msra.mxu1 %v1554_v8  ;;  %1165 = vmatprep.mubr.f32.mxu1 %v1566_v20 }
  0xaf   :  { %1250 = vmatmul.mubr.msk.f32.vlgmr.msra.gmra.mrb[0].mxu0 %vm78_vm0, %v1570_v25 }
  0xb0   :  { %1252 = vmatprep.mubr.msk.f32.mxu0 %vm78_vm0, %v1556_v14 }
  0xb1   :  { %1166 = vmatmul.mubr.f32.vlgmr.msra.gmra.mrb[0].mxu1 %v1580_v32 }
  0xb2   :  { %1168 = vmatprep.mubr.f32.mxu1 %v1564_v19 }
  0xb3   :  { %1253 = vmatmul.mubr.msk.f32.gmra.mrb[2].mxu0 %vm78_vm0, %v1568_v24 }
  0xb4   :  { %1255 = vmatprep.mubr.msk.f32.mxu0 %vm78_vm0, %v1585_v38 }
  0xb5   :  { %1169 = vmatmul.mubr.f32.gmra.mrb[2].mxu1 %v1578_v30 }
  0xb6   :  { %1171 = vmatprep.mubr.f32.mxu1 %v1596_v49 }
  0xb7   :  { %1256 = vmatmul.mubr.msk.f32.gmra.mrb[4].mxu0 %vm78_vm0, %v1583_v37 }
  0xb8   :  { %1258 = vmatprep.mubr.msk.f32.mxu0 %vm78_vm0, %v1603_v57 }
  0xb9   :  { %1172 = vmatmul.mubr.f32.gmra.mrb[4].mxu1 %v1594_v48 }
  0xba   :  { %1174 = vmatprep.mubr.f32.mxu1 %v1614_v2 }
  0xbb   :  { %1259 = vmatmul.mubr.msk.f32.gmra.mrb[6].mxu0 %vm78_vm0, %v1601_v55 }
  0xbd   :  { %1175 = vmatmul.mubr.f32.gmra.mrb[6].mxu1 %v1612_v0 }
 0x182   :  { %v1251_v15 = vpop.f32.mrb[0].mxu0 }
 0x183   :  { %v895_v21 = vpop.f32.mrb[1].mxu0 }
 0x184   :  { %v1167_v31 = vpop.f32.mrb[0].mxu1 }
 0x185   :  { %v1357_v36 = vadd.f32 %v1251_v15, %v1167_v31  ;;  %v493_v56 = vpop.f32.mrb[1].mxu1 }
 0x186   :  { %v1254_v62 = vpop.f32.mrb[2].mxu0  ;;  %v1358_v1 = vadd.f32 %v895_v21, %v493_v56 }
 0x187   :  { %942 = vst [vmem:[#allocation2 + $0x8] sm:$0xff] %v1357_v36  ;;  %v907_v4 = vpop.f32.mrb[3].mxu0 }
 0x188   :  { %941 = vst [vmem:[#allocation2] sm:$0xff] %v1358_v1  ;;  %v1170_v5 = vpop.f32.mrb[2].mxu1 }
 0x189   :  { %v1359_v6 = vadd.f32 %v1254_v62, %v1170_v5  ;;  %v507_v7 = vpop.f32.mrb[3].mxu1 }
 0x18a   :  { %v1257_v8 = vpop.f32.mrb[4].mxu0  ;;  %v1360_v14 = vadd.f32 %v907_v4, %v507_v7 }
 0x18b   :  { %944 = vst [vmem:[#allocation2 + $0x18] sm:$0xff] %v1359_v6  ;;  %v919_v16 = vpop.f32.mrb[5].mxu0 }
 0x18c   :  { %943 = vst [vmem:[#allocation2 + $0x10] sm:$0xff] %v1360_v14  ;;  %v1173_v19 = vpop.f32.mrb[4].mxu1 }
 0x18d   :  { %v1361_v20 = vadd.f32 %v1257_v8, %v1173_v19  ;;  %v521_v22 = vpop.f32.mrb[5].mxu1 }
 0x18e   :  { %v1260_v23 = vpop.f32.mrb[6].mxu0  ;;  %v1362_v24 = vadd.f32 %v919_v16, %v521_v22 }
 0x18f   :  { %946 = vst [vmem:[#allocation2 + $0x28] sm:$0xff] %v1361_v20  ;;  %v931_v25 = vpop.f32.mrb[7].mxu0 }
 0x190   :  { %945 = vst [vmem:[#allocation2 + $0x20] sm:$0xff] %v1362_v24  ;;  %v1176_v26 = vpop.f32.mrb[6].mxu1 }
 0x191   :  { %v1363_v27 = vadd.f32 %v1260_v23, %v1176_v26  ;;  %v535_v28 = vpop.f32.mrb[7].mxu1 }
 0x192   :  { %v1364_v29 = vadd.f32 %v931_v25, %v535_v28 }
 0x193   :  { %948 = vst [vmem:[#allocation2 + $0x38] sm:$0xff] %v1363_v27 }
 0x194   :  { %947 = vst [vmem:[#allocation2 + $0x30] sm:$0xff] %v1364_v29 }
 0x195   :  { %1415 = shalt.err (!%p1412_p4)
}
 0x196   :  { %s1416_s16 = scalar_lea.hbm %s1720_s2, 1024 }
 0x197   :  { %p1417_p5 = scmp.ne.s32.totalorder %s1720_s2, %s1416_s16  ;;  %p1420_p6 = scmp.lt.u32.totalorder %s1416_s16, %s1720_s2 }
 0x199   :  { %p1422_p7 = pnand %p1420_p6, %p1417_p5 }
 0x19b   :  { %1425 = shalt.err (!%p1422_p7)
}
 0x19c   :  { %s1431_s21 = smov 128   ;;  %s1432_s22 = smov 8  }
 0x19d   :  { %960 = dma.vmem_to_hbm [thread:$0]  %s955_s12, 1024, %s1720_s2, [#allocation3], %s1431_s21, %s1431_s21, %s1432_s22  }
 0x19e   :  { %1426 = dma.done.wait [#allocation3], 1024  }
 0x19f   :  { %1427 = vsyncadd [#allocation3], 4294966272 }
 0x1a0   :  { %964 = vsyncpa [#allocation3], 1 }

</bundles_post_ra>
